<compile_context>
chip_gen: v7x
topology: tpu7x:2x2x1
jax: 0.10.0
libtpu: 0.0.40
codegen_flags: <defaults>
</compile_context>

<pallas_src>
import functools

import numpy as np

import jax
import jax.numpy as jnp
from jax.experimental import pallas as pl
from jax.experimental.pallas import tpu as pltpu

LATENT_DIMENSION_HALF = 10
LATENT_DIMENSION = LATENT_DIMENSION_HALF * 2


# ----------------------------------------------------------------------------
# Fused Pallas kernel: the entire decoder for one block of batch rows.
#
# Per coarse pixel s = p*g + q (sub-pixel offsets kept in K/N, per review):
#     linear_s : (bm, latent) @ (latent, 16) -> tanh
#     up1      : (bm, 16)     @ (16, 32)     -> tanh   cols (c2, d1y, d1x)
#     up2      : (bm, 32)     @ (32, 64)     -> tanh   cols (c3, d1y,d1x,d2y,d2x)
#     up3      : (bm, 64)     @ (64, 128)              cols (oc, d1y,d2y,d3y,
#                                                             d1x,d2x,d3x)
# Each per-pixel result lands in a 128-lane-aligned slice of the output block.
# ----------------------------------------------------------------------------
def _decoder_fused_kernel(x_ref, wl_ref, w1_ref, w2_ref, w3_ref, o_ref, *,
                          n_pix):
    f32, bf16 = jnp.float32, jnp.bfloat16
    xb = x_ref[...].astype(bf16)      # (bm, latent) — cast once, reused
    w1 = w1_ref[...]                  # (16, 32)   bf16
    w2 = w2_ref[...]                  # (32, 64)   bf16
    w3 = w3_ref[...]                  # (64, 128)  bf16
    # TODO(synk): for large g (inner grid >~ 8) move this unrolled pixel loop
    #             onto a second ("arbitrary") grid axis instead of unrolling.
    for s in range(n_pix):
        h0 = jnp.tanh(jnp.dot(xb, wl_ref[s], preferred_element_type=f32))
        h1 = jnp.tanh(jnp.dot(h0.astype(bf16), w1, preferred_element_type=f32))
        h2 = jnp.tanh(jnp.dot(h1.astype(bf16), w2, preferred_element_type=f32))
        y = jnp.dot(h2.astype(bf16), w3, preferred_element_type=f32)
        o_ref[:, s * 128:(s + 1) * 128] = y.astype(o_ref.dtype)


# ----------------------------------------------------------------------------
# One-time host-side weight preparation.  Only the channel x sub-pixel mixing
# is materialized (O(1) in g); no block-diagonal pixel expansion.
# ----------------------------------------------------------------------------
def prepare_fused_weights(params, out_grid_size, dtype=jnp.bfloat16):
    """Fused per-pixel matmul weights.

    Orderings:
      wl rows   : pixel s = p*g + q; per pixel (latent, c1)
      w1 cols   : (c2, d1y, d1x)                           16 -> 32
      w2 cols   : (c3, d1y, d1x, d2y, d2x)                 32 -> 64
      w3 cols   : (oc, d1y, d2y, d3y, d1x, d2x, d3x)       64 -> 128
    """
    assert out_grid_size % 8 == 0
    g = out_grid_size // 8

    w_lin = np.asarray(params["w_lin"], np.float32)   # (latent, 16*g*g), cols (c1,p,q)
    w1 = np.asarray(params["w1"], np.float32)         # (16, 8, 2, 2)  (c1, c2, kH, kW)
    w2 = np.asarray(params["w2"], np.float32)         # (8, 4, 2, 2)   (c2, c3, kH, kW)
    w3 = np.asarray(params["w3"], np.float32)         # (4, 2, 2, 2)   (c3, oc, kH, kW)
    latent = w_lin.shape[0]
    eye2 = np.eye(2, dtype=np.float32)

    # (a) Linear, split per coarse pixel: (latent, c1, p, q) -> (s, latent, c1).
    wl = w_lin.reshape(latent, 16, g, g).transpose(2, 3, 0, 1)
    wl = wl.reshape(g * g, latent, 16)

    # (b) up1: (c1) -> (c2, d1y, d1x). Plain reshape of the PyTorch weight.
    w1f = w1.reshape(16, 8 * 2 * 2)

    # (c) up2: rows (c2, d1y, d1x) -> cols (c3, d1y, d1x, d2y, d2x).
    w2f = np.einsum("yY,xX,cCuv->cyxCYXuv", eye2, eye2, w2)
    w2f = w2f.reshape(8 * 4, 4 * 16)

    # (d) up3: rows (c3, d1y, d1x, d2y, d2x) ->
    #          cols (oc, d1y, d2y, d3y, d1x, d2x, d3x).
    w3f = np.einsum("yY,xX,uU,vV,cOst->cyxuvOYUsXVt",
                    eye2, eye2, eye2, eye2, w3)
    w3f = w3f.reshape(4 * 16, 2 * 64)

    return {"wl": jnp.asarray(wl, dtype), "w1": jnp.asarray(w1f, dtype),
            "w2": jnp.asarray(w2f, dtype), "w3": jnp.asarray(w3f, dtype)}


# ----------------------------------------------------------------------------
# Batch block size: VMEM-aware (and therefore g-aware, since the output block
# is bm*128*g^2 f32), megacore-aware (>= 2 batch blocks once B >= 16).
# ----------------------------------------------------------------------------
def _pick_block_b(B, latent, n_out, *, vmem_budget=16 << 20, max_block=512):
    # f32 bytes/row resident: double-buffered x + out blocks + live intermediates.
    per_row = 4 * (2 * latent + 2 * n_out + (16 + 32 + 64 + 128))
    cap = max(8, (vmem_budget // per_row) // 8 * 8)
    bm = min(B, max_block, cap)
    if bm < B and bm % 8:          # interior blocks must be sublane multiples
        bm = max(8, (bm // 8) * 8)
    # v7x megacore: prefer >= 2 batch blocks so "parallel" actually shards.
    if B >= 16 and pl.cdiv(B, bm) < 2:
        bm = ((pl.cdiv(B, 2) + 7) // 8) * 8
    return bm


# ----------------------------------------------------------------------------
# Wrapper: one pallas_call + a tiny subband -> NCHW rearrangement.
# ----------------------------------------------------------------------------
def decoder_forward(x, fused, out_grid_size):
    B, latent = x.shape
    g = out_grid_size // 8
    n_pix = g * g
    n_out = 128 * n_pix            # per row: (s, oc, d1y,d2y,d3y, d1x,d2x,d3x)

    wl, w1f, w2f, w3f = fused["wl"], fused["w1"], fused["w2"], fused["w3"]

    bm = _pick_block_b(B, latent, n_out)
    grid = (pl.cdiv(B, bm),)

    weight_bytes = sum(int(w.size) * w.dtype.itemsize
                       for w in (wl, w1f, w2f, w3f))
    # Explicit scoped-VMEM limit (review item #3): double-buffered x/out blocks
    # + (double-buffered) weights + live intermediates, with headroom.
    working_set = (2 * bm * latent * 4 + 2 * bm * n_out * 4
                   + 2 * weight_bytes + bm * (16 + 32 + 64 + 128) * 4)
    vmem_limit = int(min(64 << 20, max(8 << 20, (working_set * 3) // 2)))

    flops = 2 * B * n_pix * (latent * 16 + 16 * 32 + 32 * 64 + 64 * 128)
    transcendentals = B * n_pix * (16 + 32 + 64)
    bytes_accessed = 4 * (x.size + B * n_out) + weight_bytes * grid[0]

    out_flat = pl.pallas_call(
        functools.partial(_decoder_fused_kernel, n_pix=n_pix),
        out_shape=jax.ShapeDtypeStruct((B, n_out), jnp.float32),
        grid=grid,
        in_specs=[
            pl.BlockSpec((bm, latent), lambda i: (i, 0)),
            # Constant index_map -> fetched once, kept resident across blocks.
            # (~24 KiB total bf16, so even default double-buffering is free.)
            pl.BlockSpec(wl.shape, lambda i: (0, 0, 0)),
            pl.BlockSpec(w1f.shape, lambda i: (0, 0)),
            pl.BlockSpec(w2f.shape, lambda i: (0, 0)),
            pl.BlockSpec(w3f.shape, lambda i: (0, 0)),
        ],
        out_specs=pl.BlockSpec((bm, n_out), lambda i: (i, 0)),
        compiler_params=pltpu.CompilerParams(
            dimension_semantics=("parallel",),
            vmem_limit_bytes=vmem_limit),
        cost_estimate=pl.CostEstimate(
            flops=int(flops),
            transcendentals=int(transcendentals),
            bytes_accessed=int(bytes_accessed)),
    )(x, wl, w1f, w2f, w3f)

    # Tiny subband -> NCHW interleave (B*2*64*g^2 elements) in the wrapper:
    # (b, p, q, oc, d1y, d2y, d3y, d1x, d2x, d3x) -> (b, oc, H, W).
    y = out_flat.reshape(B, g, g, 2, 2, 2, 2, 2, 2, 2)
    y = y.transpose(0, 3, 1, 4, 5, 6, 2, 7, 8, 9)
    return y.reshape(B, 2, out_grid_size, out_grid_size)


# ----------------------------------------------------------------------------
# Pure-JAX reference (independent derivation on the ORIGINAL PyTorch weights).
# ----------------------------------------------------------------------------
def _convT_ref(h_nchw, w4):
    B, C, H, W = h_nchw.shape
    O = w4.shape[1]
    y = jnp.einsum("bcij,coxy->boixjy", h_nchw, w4)
    return y.reshape(B, O, 2 * H, 2 * W)


def reference_forward(x, params, out_grid_size):
    B = x.shape[0]
    g = out_grid_size // 8
    h = jnp.tanh(x @ params["w_lin"]).reshape(B, 16, g, g)
    h = jnp.tanh(_convT_ref(h, params["w1"]))
    h = jnp.tanh(_convT_ref(h, params["w2"]))
    return _convT_ref(h, params["w3"])


# ----------------------------------------------------------------------------
if __name__ == "__main__":
    out_grid_size = 16                     # -> inner_grid_size g = 2
    B = 2
    g = out_grid_size // 8

    key = jax.random.PRNGKey(0)
    k_x, k_lin, k_w1, k_w2, k_w3 = jax.random.split(key, 5)

    # Deterministic synthetic parameters (PyTorch shapes; Linear stored transposed).
    params = {
        # nn.Linear(latent, 16*g*g, bias=False): weight (out,in) -> stored (in,out)
        "w_lin": 0.1 * jax.random.normal(
            k_lin, (LATENT_DIMENSION, 16 * g * g), jnp.float32),
        # nn.ConvTranspose2d weights: (in_ch, out_ch, kH, kW)
        "w1": 0.1 * jax.random.normal(k_w1, (16, 8, 2, 2), jnp.float32),
        "w2": 0.1 * jax.random.normal(k_w2, (8, 4, 2, 2), jnp.float32),
        "w3": 0.1 * jax.random.normal(k_w3, (4, 2, 2, 2), jnp.float32),
    }

    x = jax.random.normal(k_x, (B, LATENT_DIMENSION), jnp.float32)

    # One-time host-side weight preparation (bf16, O(1) in g).
    fused = prepare_fused_weights(params, out_grid_size)

    fwd = jax.jit(functools.partial(decoder_forward, out_grid_size=out_grid_size))
    out = jax.block_until_ready(fwd(x, fused))

    assert out.shape == (B, 2, out_grid_size, out_grid_size), out.shape
    ref = reference_forward(x, params, out_grid_size)
    err = float(jnp.max(jnp.abs(out - ref)))
    # bf16 weights/activations (f32 accumulation): tolerance relaxed per review.
    assert jnp.allclose(out, ref, atol=5e-3, rtol=5e-3), err

    print("KERNEL_OK")
</pallas_src>

<mosaic_0001>
module attributes {stable_mosaic.version = 11 : i64} {
  func.func @_decoder_fused_kernel(%arg0: i32, %arg1: memref<2x20xf32, #tpu.memory_space<vmem>>, %arg2: memref<4x20x16xbf16, #tpu.memory_space<vmem>>, %arg3: memref<16x32xbf16, #tpu.memory_space<vmem>>, %arg4: memref<32x64xbf16, #tpu.memory_space<vmem>>, %arg5: memref<64x128xbf16, #tpu.memory_space<vmem>>, %arg6: memref<2x512xf32, #tpu.memory_space<vmem>>) attributes {dimension_semantics = [#tpu.dimension_semantics<parallel>], iteration_bounds = array<i64: 1>, scalar_prefetch = 0 : i64, scratch_operands = 0 : i64, tpu.core_type = #tpu.core_type<tc>, window_params = [{transform_indices = @transform_0, window_bounds = array<i64: 2, 20>}, {pipeline_mode = #tpu.pipeline_mode<synchronous>, transform_indices = @transform_1, window_bounds = array<i64: 4, 20, 16>}, {pipeline_mode = #tpu.pipeline_mode<synchronous>, transform_indices = @transform_2, window_bounds = array<i64: 16, 32>}, {pipeline_mode = #tpu.pipeline_mode<synchronous>, transform_indices = @transform_3, window_bounds = array<i64: 32, 64>}, {pipeline_mode = #tpu.pipeline_mode<synchronous>, transform_indices = @transform_4, window_bounds = array<i64: 64, 128>}, {transform_indices = @transform_5, window_bounds = array<i64: 2, 512>}]} {
    %c0 = arith.constant 0 : index
    %c0_0 = arith.constant 0 : index
    %0 = vector.load %arg1[%c0, %c0_0] : memref<2x20xf32, #tpu.memory_space<vmem>>, vector<2x20xf32>
    %1 = arith.truncf %0 : vector<2x20xf32> to vector<2x20xbf16>
    %c0_1 = arith.constant 0 : index
    %c0_2 = arith.constant 0 : index
    %2 = vector.load %arg3[%c0_1, %c0_2] : memref<16x32xbf16, #tpu.memory_space<vmem>>, vector<16x32xbf16>
    %c0_3 = arith.constant 0 : index
    %c0_4 = arith.constant 0 : index
    %3 = vector.load %arg4[%c0_3, %c0_4] : memref<32x64xbf16, #tpu.memory_space<vmem>>, vector<32x64xbf16>
    %c0_5 = arith.constant 0 : index
    %c0_6 = arith.constant 0 : index
    %4 = vector.load %arg5[%c0_5, %c0_6] : memref<64x128xbf16, #tpu.memory_space<vmem>>, vector<64x128xbf16>
    %c0_7 = arith.constant 0 : index
    %c0_8 = arith.constant 0 : index
    %c0_9 = arith.constant 0 : index
    %5 = vector.load %arg2[%c0_7, %c0_8, %c0_9] : memref<4x20x16xbf16, #tpu.memory_space<vmem>>, vector<1x20x16xbf16>
    %6 = vector.shape_cast %5 : vector<1x20x16xbf16> to vector<20x16xbf16>
    %cst = arith.constant dense<0.000000e+00> : vector<2x16xf32>
    %7 = tpu.matmul %1, %6, %cst {dimension_numbers = #tpu.dot_dimension_numbers<[1], [0], [0], [1], [0, 0, 1, 1], [], []>} : vector<2x20xbf16>, vector<20x16xbf16>, vector<2x16xf32> -> vector<2x16xf32>
    %8 = math.tanh %7 : vector<2x16xf32>
    %9 = arith.truncf %8 : vector<2x16xf32> to vector<2x16xbf16>
    %cst_10 = arith.constant dense<0.000000e+00> : vector<2x32xf32>
    %10 = tpu.matmul %9, %2, %cst_10 {dimension_numbers = #tpu.dot_dimension_numbers<[1], [0], [0], [1], [0, 0, 1, 1], [], []>} : vector<2x16xbf16>, vector<16x32xbf16>, vector<2x32xf32> -> vector<2x32xf32>
    %11 = math.tanh %10 : vector<2x32xf32>
    %12 = arith.truncf %11 : vector<2x32xf32> to vector<2x32xbf16>
    %cst_11 = arith.constant dense<0.000000e+00> : vector<2x64xf32>
    %13 = tpu.matmul %12, %3, %cst_11 {dimension_numbers = #tpu.dot_dimension_numbers<[1], [0], [0], [1], [0, 0, 1, 1], [], []>} : vector<2x32xbf16>, vector<32x64xbf16>, vector<2x64xf32> -> vector<2x64xf32>
    %14 = math.tanh %13 : vector<2x64xf32>
    %15 = arith.truncf %14 : vector<2x64xf32> to vector<2x64xbf16>
    %cst_12 = arith.constant dense<0.000000e+00> : vector<2x128xf32>
    %16 = tpu.matmul %15, %4, %cst_12 {dimension_numbers = #tpu.dot_dimension_numbers<[1], [0], [0], [1], [0, 0, 1, 1], [], []>} : vector<2x64xbf16>, vector<64x128xbf16>, vector<2x128xf32> -> vector<2x128xf32>
    %c0_13 = arith.constant 0 : index
    %c0_14 = arith.constant 0 : index
    %17 = vector.load %arg6[%c0_13, %c0_14] : memref<2x512xf32, #tpu.memory_space<vmem>>, vector<2x128xf32>
    tpu.vector_store %arg6[%c0_13, %c0_14], %16 {strides = array<i32>} : memref<2x512xf32, #tpu.memory_space<vmem>>, vector<2x128xf32>,
    %c1 = arith.constant 1 : index
    %c0_15 = arith.constant 0 : index
    %c0_16 = arith.constant 0 : index
    %18 = vector.load %arg2[%c1, %c0_15, %c0_16] : memref<4x20x16xbf16, #tpu.memory_space<vmem>>, vector<1x20x16xbf16>
    %19 = vector.shape_cast %18 : vector<1x20x16xbf16> to vector<20x16xbf16>
    %cst_17 = arith.constant dense<0.000000e+00> : vector<2x16xf32>
    %20 = tpu.matmul %1, %19, %cst_17 {dimension_numbers = #tpu.dot_dimension_numbers<[1], [0], [0], [1], [0, 0, 1, 1], [], []>} : vector<2x20xbf16>, vector<20x16xbf16>, vector<2x16xf32> -> vector<2x16xf32>
    %21 = math.tanh %20 : vector<2x16xf32>
    %22 = arith.truncf %21 : vector<2x16xf32> to vector<2x16xbf16>
    %cst_18 = arith.constant dense<0.000000e+00> : vector<2x32xf32>
    %23 = tpu.matmul %22, %2, %cst_18 {dimension_numbers = #tpu.dot_dimension_numbers<[1], [0], [0], [1], [0, 0, 1, 1], [], []>} : vector<2x16xbf16>, vector<16x32xbf16>, vector<2x32xf32> -> vector<2x32xf32>
    %24 = math.tanh %23 : vector<2x32xf32>
    %25 = arith.truncf %24 : vector<2x32xf32> to vector<2x32xbf16>
    %cst_19 = arith.constant dense<0.000000e+00> : vector<2x64xf32>
    %26 = tpu.matmul %25, %3, %cst_19 {dimension_numbers = #tpu.dot_dimension_numbers<[1], [0], [0], [1], [0, 0, 1, 1], [], []>} : vector<2x32xbf16>, vector<32x64xbf16>, vector<2x64xf32> -> vector<2x64xf32>
    %27 = math.tanh %26 : vector<2x64xf32>
    %28 = arith.truncf %27 : vector<2x64xf32> to vector<2x64xbf16>
    %cst_20 = arith.constant dense<0.000000e+00> : vector<2x128xf32>
    %29 = tpu.matmul %28, %4, %cst_20 {dimension_numbers = #tpu.dot_dimension_numbers<[1], [0], [0], [1], [0, 0, 1, 1], [], []>} : vector<2x64xbf16>, vector<64x128xbf16>, vector<2x128xf32> -> vector<2x128xf32>
    %c0_21 = arith.constant 0 : index
    %c128 = arith.constant 128 : index
    %30 = vector.load %arg6[%c0_21, %c128] : memref<2x512xf32, #tpu.memory_space<vmem>>, vector<2x128xf32>
    tpu.vector_store %arg6[%c0_21, %c128], %29 {strides = array<i32>} : memref<2x512xf32, #tpu.memory_space<vmem>>, vector<2x128xf32>,
    %c2 = arith.constant 2 : index
    %c0_22 = arith.constant 0 : index
    %c0_23 = arith.constant 0 : index
    %31 = vector.load %arg2[%c2, %c0_22, %c0_23] : memref<4x20x16xbf16, #tpu.memory_space<vmem>>, vector<1x20x16xbf16>
    %32 = vector.shape_cast %31 : vector<1x20x16xbf16> to vector<20x16xbf16>
    %cst_24 = arith.constant dense<0.000000e+00> : vector<2x16xf32>
    %33 = tpu.matmul %1, %32, %cst_24 {dimension_numbers = #tpu.dot_dimension_numbers<[1], [0], [0], [1], [0, 0, 1, 1], [], []>} : vector<2x20xbf16>, vector<20x16xbf16>, vector<2x16xf32> -> vector<2x16xf32>
    %34 = math.tanh %33 : vector<2x16xf32>
    %35 = arith.truncf %34 : vector<2x16xf32> to vector<2x16xbf16>
    %cst_25 = arith.constant dense<0.000000e+00> : vector<2x32xf32>
    %36 = tpu.matmul %35, %2, %cst_25 {dimension_numbers = #tpu.dot_dimension_numbers<[1], [0], [0], [1], [0, 0, 1, 1], [], []>} : vector<2x16xbf16>, vector<16x32xbf16>, vector<2x32xf32> -> vector<2x32xf32>
    %37 = math.tanh %36 : vector<2x32xf32>
    %38 = arith.truncf %37 : vector<2x32xf32> to vector<2x32xbf16>
    %cst_26 = arith.constant dense<0.000000e+00> : vector<2x64xf32>
    %39 = tpu.matmul %38, %3, %cst_26 {dimension_numbers = #tpu.dot_dimension_numbers<[1], [0], [0], [1], [0, 0, 1, 1], [], []>} : vector<2x32xbf16>, vector<32x64xbf16>, vector<2x64xf32> -> vector<2x64xf32>
    %40 = math.tanh %39 : vector<2x64xf32>
    %41 = arith.truncf %40 : vector<2x64xf32> to vector<2x64xbf16>
    %cst_27 = arith.constant dense<0.000000e+00> : vector<2x128xf32>
    %42 = tpu.matmul %41, %4, %cst_27 {dimension_numbers = #tpu.dot_dimension_numbers<[1], [0], [0], [1], [0, 0, 1, 1], [], []>} : vector<2x64xbf16>, vector<64x128xbf16>, vector<2x128xf32> -> vector<2x128xf32>
    %c0_28 = arith.constant 0 : index
    %c256 = arith.constant 256 : index
    %43 = vector.load %arg6[%c0_28, %c256] : memref<2x512xf32, #tpu.memory_space<vmem>>, vector<2x128xf32>
    tpu.vector_store %arg6[%c0_28, %c256], %42 {strides = array<i32>} : memref<2x512xf32, #tpu.memory_space<vmem>>, vector<2x128xf32>,
    %c3 = arith.constant 3 : index
    %c0_29 = arith.constant 0 : index
    %c0_30 = arith.constant 0 : index
    %44 = vector.load %arg2[%c3, %c0_29, %c0_30] : memref<4x20x16xbf16, #tpu.memory_space<vmem>>, vector<1x20x16xbf16>
    %45 = vector.shape_cast %44 : vector<1x20x16xbf16> to vector<20x16xbf16>
    %cst_31 = arith.constant dense<0.000000e+00> : vector<2x16xf32>
    %46 = tpu.matmul %1, %45, %cst_31 {dimension_numbers = #tpu.dot_dimension_numbers<[1], [0], [0], [1], [0, 0, 1, 1], [], []>} : vector<2x20xbf16>, vector<20x16xbf16>, vector<2x16xf32> -> vector<2x16xf32>
    %47 = math.tanh %46 : vector<2x16xf32>
    %48 = arith.truncf %47 : vector<2x16xf32> to vector<2x16xbf16>
    %cst_32 = arith.constant dense<0.000000e+00> : vector<2x32xf32>
    %49 = tpu.matmul %48, %2, %cst_32 {dimension_numbers = #tpu.dot_dimension_numbers<[1], [0], [0], [1], [0, 0, 1, 1], [], []>} : vector<2x16xbf16>, vector<16x32xbf16>, vector<2x32xf32> -> vector<2x32xf32>
    %50 = math.tanh %49 : vector<2x32xf32>
    %51 = arith.truncf %50 : vector<2x32xf32> to vector<2x32xbf16>
    %cst_33 = arith.constant dense<0.000000e+00> : vector<2x64xf32>
    %52 = tpu.matmul %51, %3, %cst_33 {dimension_numbers = #tpu.dot_dimension_numbers<[1], [0], [0], [1], [0, 0, 1, 1], [], []>} : vector<2x32xbf16>, vector<32x64xbf16>, vector<2x64xf32> -> vector<2x64xf32>
    %53 = math.tanh %52 : vector<2x64xf32>
    %54 = arith.truncf %53 : vector<2x64xf32> to vector<2x64xbf16>
    %cst_34 = arith.constant dense<0.000000e+00> : vector<2x128xf32>
    %55 = tpu.matmul %54, %4, %cst_34 {dimension_numbers = #tpu.dot_dimension_numbers<[1], [0], [0], [1], [0, 0, 1, 1], [], []>} : vector<2x64xbf16>, vector<64x128xbf16>, vector<2x128xf32> -> vector<2x128xf32>
    %c0_35 = arith.constant 0 : index
    %c384 = arith.constant 384 : index
    %56 = vector.load %arg6[%c0_35, %c384] : memref<2x512xf32, #tpu.memory_space<vmem>>, vector<2x128xf32>
    tpu.vector_store %arg6[%c0_35, %c384], %55 {strides = array<i32>} : memref<2x512xf32, #tpu.memory_space<vmem>>, vector<2x128xf32>,
    return
  }
  func.func @transform_0(%arg0: i32) -> (i32, i32) {
    %c0_i32 = arith.constant 0 : i32
    %c0_i32_0 = arith.constant 0 : i32
    return %arg0, %c0_i32 : i32, i32
  }
  func.func @transform_1(%arg0: i32) -> (i32, i32, i32) {
    %c0_i32 = arith.constant 0 : i32
    %c0_i32_0 = arith.constant 0 : i32
    %c0_i32_1 = arith.constant 0 : i32
    %c0_i32_2 = arith.constant 0 : i32
    return %c0_i32, %c0_i32_0, %c0_i32_1 : i32, i32, i32
  }
  func.func @transform_2(%arg0: i32) -> (i32, i32) {
    %c0_i32 = arith.constant 0 : i32
    %c0_i32_0 = arith.constant 0 : i32
    %c0_i32_1 = arith.constant 0 : i32
    return %c0_i32, %c0_i32_0 : i32, i32
  }
  func.func @transform_3(%arg0: i32) -> (i32, i32) {
    %c0_i32 = arith.constant 0 : i32
    %c0_i32_0 = arith.constant 0 : i32
    %c0_i32_1 = arith.constant 0 : i32
    return %c0_i32, %c0_i32_0 : i32, i32
  }
  func.func @transform_4(%arg0: i32) -> (i32, i32) {
    %c0_i32 = arith.constant 0 : i32
    %c0_i32_0 = arith.constant 0 : i32
    %c0_i32_1 = arith.constant 0 : i32
    return %c0_i32, %c0_i32_0 : i32, i32
  }
  func.func @transform_5(%arg0: i32) -> (i32, i32) {
    %c0_i32 = arith.constant 0 : i32
    %c0_i32_0 = arith.constant 0 : i32
    return %arg0, %c0_i32 : i32, i32
  }
}

</mosaic_0001>

<bundles_post_ra>
// kernel: decoder_forward.1
= control target key start
LH: loop header
LB: loop body
LE: loop exit
PB: predicated region body
PF: predicated region fallthrough
CT: control target
= control target key end

     0   :  { %v1127_v0 = vmov 0.0   ;;  %vm53_vm0 = vcmask 1041408   ;;  %vm1128_vm1 = vmmov 0   ;;  %vm49_vm2 = vcmask 162816   ;;  %s1355_s1 = inlined_call_operand.vmem [shape: bf16[4,20,16], index: 1, kind: input, shape index: {}]   ;;  %s1356_s0 = inlined_call_operand.vmem [shape: f32[2,20], index: 0, kind: input, shape index: {}]   ;;  %s1357_s2 = inlined_call_operand.vmem [shape: bf16[16,32], index: 2, kind: input, shape index: {}]   ;;  %s1358_s3 = inlined_call_operand.vmem [shape: bf16[32,64], index: 3, kind: input, shape index: {}]   ;;  %s1359_s4 = inlined_call_operand.vmem [shape: bf16[64,128], index: 4, kind: input, shape index: {}]   ;;  %s1360_s5 = inlined_call_operand.vmem [shape: f32[2,512], index: 5, kind: output, shape index: {}]  }
   0x1   :  { %950 = vmatprep.subr.bf16.mxu0 %v1127_v0  ;;  %v1088_v1 = vld [vmem:[%s1355_s1] sm:$0xff]   ;;  %954 = vmatprep.mubr.msk.bf16.mxu0 %vm1128_vm1, %v1127_v0  ;;  %v1089_v2 = vld [vmem:[%s1355_s1 + $0x8] ss:$0 sps:$4 sm:$0x33]   ;;  %vm105_vm3 = vcmask 130048   ;;  %vm163_vm4 = vcmask 261120  }
   0x2   :  { %964 = vmatprep.subr.bf16.mxu1 %v1127_v0  ;;  %968 = vmatprep.mubr.msk.bf16.mxu1 %vm1128_vm1, %v1127_v0  ;;  %v21_v3 = vld [vmem:[%s1356_s0] sm:$0x3]  ;;  %v55_v4 = vsel %vm53_vm0, %v1089_v2, 0  ;;  %v1203_v14 = vld [vmem:[%s1358_s3 + $0x8] sm:$0xff]   ;;  %v1242_v26 = vld [vmem:[%s1359_s4 + $0x10] sm:$0xff]   ;;  %vm233_vm5 = vcmask 523264  }
   0x3   :  { %951 = vmatpush3.bf16.msra.mxu0 %v1088_v1  ;;  %v1176_v5 = vpack.c.bf16 %v21_v3, %v21_v3  ;;  %v1186_v6 = vld [vmem:[%s1357_s2] sm:$0xff]   ;;  %v1093_v21 = vld [vmem:[%s1355_s1 + $0xc] sm:$0xff]   ;;  %v1094_v23 = vld [vmem:[%s1355_s1 + $0x14] ss:$0 sps:$4 sm:$0x33]  }
   0x4   :  { %952 = vmatprep.subr.bf16.mxu0 %v1127_v0  ;;  %v1196_v13 = vld [vmem:[%s1358_s3] sm:$0xff]   ;;  %v292_v24 = vsel %vm53_vm0, %v1094_v23, 0  ;;  %v1235_v25 = vld [vmem:[%s1359_s4 + $0x8] sm:$0xff]   ;;  %v1249_v27 = vld [vmem:[%s1359_s4 + $0x18] sm:$0xff]  }
   0x5   :  { %965 = vmatpush3.bf16.msra.mxu1 %v1196_v13  ;;  %v1210_v15 = vld [vmem:[%s1359_s4] sm:$0xff]   ;;  %v1099_v49 = vld [vmem:[%s1355_s1 + $0x18] sm:$0xff]  }
   0x6   :  { %966 = vmatprep.subr.bf16.mxu1 %v1127_v0  ;;  %v1100_v51 = vld [vmem:[%s1355_s1 + $0x20] ss:$0 sps:$4 sm:$0x33]  }
   0x7   :  { %953 = vmatpush3.bf16.msra.mxu0 %v55_v4  ;;  %v484_v52 = vsel %vm53_vm0, %v1100_v51, 0 }
   0x8   :  { %958 = vmatprep.subr.bf16.mxu0 %v1127_v0 }
   0x9   :  { %967 = vmatpush3.bf16.msra.mxu1 %v1203_v14 }
   0xa   :  { %955 = vmatmul.mubr.msk.bf16.vlgmr.msra.gmra.mrb[0].mxu0 %vm49_vm2, %v1176_v5  ;;  %984 = vmatprep.subr.bf16.mxu1 %v1127_v0 }
   0xb   :  { %960 = vmatprep.mubr.msk.bf16.mxu0 %vm1128_vm1, %v1127_v0  ;;  %959 = vmatpush3.bf16.msra.mxu0 %v1186_v6 }
   0xc   :  { %972 = vmatprep.subr.bf16.mxu0 %v1127_v0 }
  0xdd   :  { %v91_v7 = vpop.f32.mrb[0].mxu0 }
  0xde   :  { %1103 = vtanh.f32 %v91_v7  ;;  %v956_v8 = vpop.f32.mrb[1].mxu0 }
  0xdf   :  { %v94_v9 = vpop.f32.mrb[2].mxu0 }
  0xe0   :  { %v957_v10 = vpop.f32.mrb[3].mxu0 }
  0xe8   :  { %v1104_v11 = vpop.eup %1103 }
  0xe9   :  { %v98_v12 = vpack.c.bf16 %v1104_v11, %v1104_v11 }
  0xeb   :  { %961 = vmatmul.mubr.msk.bf16.vlgmr.msra.gmra.mrb[4].mxu0 %vm105_vm3, %v98_v12 }
  0xec   :  { %980 = vmatprep.mubr.msk.bf16.mxu0 %vm1128_vm1, %v1127_v0  ;;  %973 = vmatpush3.bf16.msra.mxu0 %v1210_v15 }
  0xed   :  { %974 = vmatprep.subr.bf16.mxu0 %v1127_v0 }
  0xf0   :  { %975 = vmatpush3.bf16.msra.mxu0 %v1235_v25 }
  0xf1   :  { %976 = vmatprep.subr.bf16.mxu0 %v1127_v0 }
  0xf4   :  { %977 = vmatpush3.bf16.msra.mxu0 %v1242_v26 }
  0xf5   :  { %978 = vmatprep.subr.bf16.mxu0 %v1127_v0 }
  0xf8   :  { %979 = vmatpush3.bf16.msra.mxu0 %v1249_v27 }
  0xf9   :  { %998 = vmatprep.subr.bf16.mxu0 %v1127_v0 }
 0x1be   :  { %v143_v16 = vpop.f32.mrb[4].mxu0 }
 0x1bf   :  { %1105 = vtanh.f32 %v143_v16  ;;  %v962_v17 = vpop.f32.mrb[5].mxu0  ;;  %v1101_v16 = vld [vmem:[%s1355_s1 + $0x24] sm:$0xff]  }
 0x1c0   :  { %v146_v18 = vpop.f32.mrb[6].mxu0 }
 0x1c1   :  { %v963_v19 = vpop.f32.mrb[7].mxu0  ;;  %v1102_v18 = vld [vmem:[%s1355_s1 + $0x2c] ss:$0 sps:$4 sm:$0x33]  }
 0x1c2   :  { %v676_v19 = vsel %vm53_vm0, %v1102_v18, 0 }
 0x1c9   :  { %v1106_v20 = vpop.eup %1105 }
 0x1ca   :  { %v150_v22 = vpack.c.bf16 %v1106_v20, %v1106_v20 }
 0x1cc   :  { %969 = vmatmul.mubr.msk.bf16.vlgmr.msra.gmra.mrb[0].mxu1 %vm163_vm4, %v150_v22 }
 0x1cd   :  { %985 = vmatpush3.bf16.msra.mxu1 %v1093_v21  ;;  %988 = vmatprep.mubr.msk.bf16.mxu1 %vm1128_vm1, %v1127_v0 }
 0x1ce   :  { %986 = vmatprep.subr.bf16.mxu1 %v1127_v0 }
 0x1d1   :  { %987 = vmatpush3.bf16.msra.mxu1 %v292_v24 }
 0x1d2   :  { %992 = vmatprep.subr.bf16.mxu1 %v1127_v0 }
 0x1d4   :  { %989 = vmatmul.mubr.msk.bf16.vlgmr.msra.gmra.mrb[4].mxu1 %vm49_vm2, %v1176_v5 }
 0x1d5   :  { %993 = vmatpush3.bf16.msra.mxu1 %v1186_v6  ;;  %994 = vmatprep.mubr.msk.bf16.mxu1 %vm1128_vm1, %v1127_v0 }
 0x1d6   :  { %1006 = vmatprep.subr.bf16.mxu1 %v1127_v0 }
 0x29f   :  { %v201_v28 = vpop.f32.mrb[0].mxu1 }
 0x2a0   :  { %1107 = vtanh.f32 %v201_v28  ;;  %v970_v29 = vpop.f32.mrb[1].mxu1 }
 0x2a1   :  { %v204_v30 = vpop.f32.mrb[2].mxu1 }
 0x2a2   :  { %v971_v31 = vpop.f32.mrb[3].mxu1 }
 0x2a7   :  { %v328_v32 = vpop.f32.mrb[4].mxu1 }
 0x2a8   :  { %1109 = vtanh.f32 %v328_v32  ;;  %v990_v33 = vpop.f32.mrb[5].mxu1 }
 0x2a9   :  { %v331_v34 = vpop.f32.mrb[6].mxu1 }
 0x2aa   :  { %v1108_v35 = vpop.eup %1107  ;;  %v991_v36 = vpop.f32.mrb[7].mxu1 }
 0x2ab   :  { %v208_v37 = vpack.c.bf16 %v1108_v35, %v1108_v35 }
 0x2ad   :  { %981 = vmatmul.mubr.msk.bf16.vlgmr.msra.gmra.mrb[8].mxu0 %vm233_vm5, %v208_v37 }
 0x2ae   :  { %999 = vmatpush3.bf16.msra.mxu0 %v1196_v13  ;;  %1002 = vmatprep.mubr.msk.bf16.mxu0 %vm1128_vm1, %v1127_v0 }
 0x2af   :  { %1000 = vmatprep.subr.bf16.mxu0 %v1127_v0 }
 0x2b2   :  { %v1110_v38 = vpop.eup %1109  ;;  %1001 = vmatpush3.bf16.msra.mxu0 %v1203_v14 }
 0x2b3   :  { %v335_v39 = vpack.c.bf16 %v1110_v38, %v1110_v38  ;;  %1018 = vmatprep.subr.bf16.mxu0 %v1127_v0 }
 0x2b5   :  { %995 = vmatmul.mubr.msk.bf16.vlgmr.msra.gmra.mrb[8].mxu1 %vm105_vm3, %v335_v39 }
 0x2b6   :  { %1007 = vmatpush3.bf16.msra.mxu1 %v1210_v15  ;;  %1014 = vmatprep.mubr.msk.bf16.mxu1 %vm1128_vm1, %v1127_v0 }
 0x2b7   :  { %1008 = vmatprep.subr.bf16.mxu1 %v1127_v0 }
 0x2ba   :  { %1009 = vmatpush3.bf16.msra.mxu1 %v1235_v25 }
 0x2bb   :  { %1010 = vmatprep.subr.bf16.mxu1 %v1127_v0 }
 0x2be   :  { %1011 = vmatpush3.bf16.msra.mxu1 %v1242_v26 }
 0x2bf   :  { %1012 = vmatprep.subr.bf16.mxu1 %v1127_v0 }
 0x2c2   :  { %1013 = vmatpush3.bf16.msra.mxu1 %v1249_v27 }
 0x2c3   :  { %1032 = vmatprep.subr.bf16.mxu1 %v1127_v0 }
 0x380   :  { %v271_v40 = vpop.f32.mrb[8].mxu0 }
 0x381   :  { %277 = vst [vmem:[%s1360_s5] sm:$0x3] %v271_v40  ;;  %v982_v41 = vpop.f32.mrb[9].mxu0 }
 0x382   :  { %v274_v42 = vpop.f32.mrb[10].mxu0 }
 0x383   :  { %v983_v43 = vpop.f32.mrb[11].mxu0 }
 0x388   :  { %v373_v44 = vpop.f32.mrb[8].mxu1 }
 0x389   :  { %1111 = vtanh.f32 %v373_v44  ;;  %v996_v45 = vpop.f32.mrb[9].mxu1 }
 0x38a   :  { %v376_v46 = vpop.f32.mrb[10].mxu1 }
 0x38b   :  { %v997_v47 = vpop.f32.mrb[11].mxu1 }
 0x393   :  { %v1112_v48 = vpop.eup %1111 }
 0x394   :  { %v380_v50 = vpack.c.bf16 %v1112_v48, %v1112_v48 }
 0x396   :  { %1003 = vmatmul.mubr.msk.bf16.vlgmr.msra.gmra.mrb[12].mxu0 %vm163_vm4, %v380_v50 }
 0x397   :  { %1019 = vmatpush3.bf16.msra.mxu0 %v1099_v49  ;;  %1022 = vmatprep.mubr.msk.bf16.mxu0 %vm1128_vm1, %v1127_v0 }
 0x398   :  { %1020 = vmatprep.subr.bf16.mxu0 %v1127_v0 }
 0x39b   :  { %1021 = vmatpush3.bf16.msra.mxu0 %v484_v52 }
 0x39c   :  { %1026 = vmatprep.subr.bf16.mxu0 %v1127_v0 }
 0x39e   :  { %1023 = vmatmul.mubr.msk.bf16.vlgmr.msra.gmra.mrb[16].mxu0 %vm49_vm2, %v1176_v5 }
 0x39f   :  { %1027 = vmatpush3.bf16.msra.mxu0 %v1186_v6  ;;  %1028 = vmatprep.mubr.msk.bf16.mxu0 %vm1128_vm1, %v1127_v0 }
 0x3a0   :  { %1040 = vmatprep.subr.bf16.mxu0 %v1127_v0 }
 0x469   :  { %v418_v53 = vpop.f32.mrb[12].mxu0 }
 0x46a   :  { %1113 = vtanh.f32 %v418_v53  ;;  %v1004_v54 = vpop.f32.mrb[13].mxu0 }
 0x46b   :  { %v421_v55 = vpop.f32.mrb[14].mxu0 }
 0x46c   :  { %v1005_v56 = vpop.f32.mrb[15].mxu0 }
 0x471   :  { %v520_v57 = vpop.f32.mrb[16].mxu0 }
 0x472   :  { %1115 = vtanh.f32 %v520_v57  ;;  %v1024_v58 = vpop.f32.mrb[17].mxu0 }
 0x473   :  { %v523_v59 = vpop.f32.mrb[18].mxu0 }
 0x474   :  { %v1114_v60 = vpop.eup %1113  ;;  %v1025_v61 = vpop.f32.mrb[19].mxu0 }
 0x475   :  { %v425_v62 = vpack.c.bf16 %v1114_v60, %v1114_v60 }
 0x477   :  { %1015 = vmatmul.mubr.msk.bf16.vlgmr.msra.gmra.mrb[12].mxu1 %vm233_vm5, %v425_v62 }
 0x478   :  { %1033 = vmatpush3.bf16.msra.mxu1 %v1196_v13  ;;  %1036 = vmatprep.mubr.msk.bf16.mxu1 %vm1128_vm1, %v1127_v0 }
 0x479   :  { %1034 = vmatprep.subr.bf16.mxu1 %v1127_v0 }
 0x47c   :  { %v1116_v63 = vpop.eup %1115  ;;  %1035 = vmatpush3.bf16.msra.mxu1 %v1203_v14 }
 0x47d   :  { %v527_v1 = vpack.c.bf16 %v1116_v63, %v1116_v63  ;;  %1052 = vmatprep.subr.bf16.mxu1 %v1127_v0 }
 0x47f   :  { %1029 = vmatmul.mubr.msk.bf16.vlgmr.msra.gmra.mrb[20].mxu0 %vm105_vm3, %v527_v1 }
 0x480   :  { %1041 = vmatpush3.bf16.msra.mxu0 %v1210_v15  ;;  %1048 = vmatprep.mubr.msk.bf16.mxu0 %vm1128_vm1, %v1127_v0 }
 0x481   :  { %1042 = vmatprep.subr.bf16.mxu0 %v1127_v0 }
 0x484   :  { %1043 = vmatpush3.bf16.msra.mxu0 %v1235_v25 }
 0x485   :  { %1044 = vmatprep.subr.bf16.mxu0 %v1127_v0 }
 0x488   :  { %1045 = vmatpush3.bf16.msra.mxu0 %v1242_v26 }
 0x489   :  { %1046 = vmatprep.subr.bf16.mxu0 %v1127_v0 }
 0x48c   :  { %1047 = vmatpush3.bf16.msra.mxu0 %v1249_v27 }
 0x48d   :  { %1066 = vmatprep.subr.bf16.mxu0 %v1127_v0 }
 0x54a   :  { %v463_v2 = vpop.f32.mrb[12].mxu1 }
 0x54b   :  { %469 = vst [vmem:[%s1360_s5 + $0x2] sm:$0x3] %v463_v2  ;;  %v1016_v3 = vpop.f32.mrb[13].mxu1 }
 0x54c   :  { %v466_v4 = vpop.f32.mrb[14].mxu1 }
 0x54d   :  { %v1017_v7 = vpop.f32.mrb[15].mxu1 }
 0x552   :  { %v565_v8 = vpop.f32.mrb[20].mxu0 }
 0x553   :  { %1117 = vtanh.f32 %v565_v8  ;;  %v1030_v9 = vpop.f32.mrb[21].mxu0 }
 0x554   :  { %v568_v10 = vpop.f32.mrb[22].mxu0 }
 0x555   :  { %v1031_v11 = vpop.f32.mrb[23].mxu0 }
 0x55d   :  { %v1118_v12 = vpop.eup %1117 }
 0x55e   :  { %v572_v17 = vpack.c.bf16 %v1118_v12, %v1118_v12 }
 0x560   :  { %1037 = vmatmul.mubr.msk.bf16.vlgmr.msra.gmra.mrb[16].mxu1 %vm163_vm4, %v572_v17 }
 0x561   :  { %1053 = vmatpush3.bf16.msra.mxu1 %v1101_v16  ;;  %1056 = vmatprep.mubr.msk.bf16.mxu1 %vm1128_vm1, %v1127_v0 }
 0x562   :  { %1054 = vmatprep.subr.bf16.mxu1 %v1127_v0 }
 0x565   :  { %1055 = vmatpush3.bf16.msra.mxu1 %v676_v19 }
 0x566   :  { %1060 = vmatprep.subr.bf16.mxu1 %v1127_v0 }
 0x568   :  { %1057 = vmatmul.mubr.msk.bf16.vlgmr.msra.gmra.mrb[20].mxu1 %vm49_vm2, %v1176_v5 }
 0x569   :  { %1061 = vmatpush3.bf16.msra.mxu1 %v1186_v6  ;;  %1062 = vmatprep.mubr.msk.bf16.mxu1 %vm1128_vm1, %v1127_v0 }
 0x56a   :  { %1074 = vmatprep.subr.bf16.mxu1 %v1127_v0 }
 0x633   :  { %v610_v20 = vpop.f32.mrb[16].mxu1 }
 0x634   :  { %1119 = vtanh.f32 %v610_v20  ;;  %v1038_v21 = vpop.f32.mrb[17].mxu1 }
 0x635   :  { %v613_v22 = vpop.f32.mrb[18].mxu1 }
 0x636   :  { %v1039_v23 = vpop.f32.mrb[19].mxu1 }
 0x63b   :  { %v712_v24 = vpop.f32.mrb[20].mxu1 }
 0x63c   :  { %1121 = vtanh.f32 %v712_v24  ;;  %v1058_v28 = vpop.f32.mrb[21].mxu1 }
 0x63d   :  { %v715_v29 = vpop.f32.mrb[22].mxu1 }
 0x63e   :  { %v1120_v30 = vpop.eup %1119  ;;  %v1059_v31 = vpop.f32.mrb[23].mxu1 }
 0x63f   :  { %v617_v32 = vpack.c.bf16 %v1120_v30, %v1120_v30 }
 0x641   :  { %1049 = vmatmul.mubr.msk.bf16.vlgmr.msra.gmra.mrb[24].mxu0 %vm233_vm5, %v617_v32 }
 0x642   :  { %1067 = vmatpush3.bf16.msra.mxu0 %v1196_v13  ;;  %1070 = vmatprep.mubr.msk.bf16.mxu0 %vm1128_vm1, %v1127_v0 }
 0x643   :  { %1068 = vmatprep.subr.bf16.mxu0 %v1127_v0 }
 0x646   :  { %v1122_v5 = vpop.eup %1121  ;;  %1069 = vmatpush3.bf16.msra.mxu0 %v1203_v14 }
 0x647   :  { %v719_v6 = vpack.c.bf16 %v1122_v5, %v1122_v5 }
 0x649   :  { %1063 = vmatmul.mubr.msk.bf16.vlgmr.msra.gmra.mrb[24].mxu1 %vm105_vm3, %v719_v6 }
 0x64a   :  { %1075 = vmatpush3.bf16.msra.mxu1 %v1210_v15  ;;  %1082 = vmatprep.mubr.msk.bf16.mxu1 %vm1128_vm1, %v1127_v0 }
 0x64b   :  { %1076 = vmatprep.subr.bf16.mxu1 %v1127_v0 }
 0x64e   :  { %1077 = vmatpush3.bf16.msra.mxu1 %v1235_v25 }
 0x64f   :  { %1078 = vmatprep.subr.bf16.mxu1 %v1127_v0 }
 0x652   :  { %1079 = vmatpush3.bf16.msra.mxu1 %v1242_v26 }
 0x653   :  { %1080 = vmatprep.subr.bf16.mxu1 %v1127_v0 }
 0x656   :  { %1081 = vmatpush3.bf16.msra.mxu1 %v1249_v27 }
 0x714   :  { %v655_v13 = vpop.f32.mrb[24].mxu0 }
 0x715   :  { %661 = vst [vmem:[%s1360_s5 + $0x4] sm:$0x3] %v655_v13  ;;  %v1050_v14 = vpop.f32.mrb[25].mxu0 }
 0x716   :  { %v658_v15 = vpop.f32.mrb[26].mxu0 }
 0x717   :  { %v1051_v33 = vpop.f32.mrb[27].mxu0 }
 0x71c   :  { %v757_v34 = vpop.f32.mrb[24].mxu1 }
 0x71d   :  { %1123 = vtanh.f32 %v757_v34  ;;  %v1064_v35 = vpop.f32.mrb[25].mxu1 }
 0x71e   :  { %v760_v25 = vpop.f32.mrb[26].mxu1 }
 0x71f   :  { %v1065_v36 = vpop.f32.mrb[27].mxu1 }
 0x727   :  { %v1124_v37 = vpop.eup %1123 }
 0x728   :  { %v764_v38 = vpack.c.bf16 %v1124_v37, %v1124_v37 }
 0x72a   :  { %1071 = vmatmul.mubr.msk.bf16.vlgmr.msra.gmra.mrb[28].mxu0 %vm163_vm4, %v764_v38 }
 0x7fd   :  { %v802_v0 = vpop.f32.mrb[28].mxu0 }
 0x7fe   :  { %1125 = vtanh.f32 %v802_v0  ;;  %v1072_v26 = vpop.f32.mrb[29].mxu0 }
 0x7ff   :  { %v805_v27 = vpop.f32.mrb[30].mxu0 }
 0x800   :  { %v1073_v39 = vpop.f32.mrb[31].mxu0 }
 0x808   :  { %v1126_v40 = vpop.eup %1125 }
 0x809   :  { %v809_v41 = vpack.c.bf16 %v1126_v40, %v1126_v40 }
 0x80b   :  { %1083 = vmatmul.mubr.msk.bf16.vlgmr.msra.gmra.mrb[28].mxu1 %vm233_vm5, %v809_v41 }
 0x8de   :  { %v847_v42 = vpop.f32.mrb[28].mxu1 }
 0x8df   :  { %853 = vst [vmem:[%s1360_s5 + $0x6] sm:$0x3] %v847_v42  ;;  %v1084_v43 = vpop.f32.mrb[29].mxu1 }
 0x8e0   :  { %v850_v44 = vpop.f32.mrb[30].mxu1 }
 0x8e1   :  { %v1085_v45 = vpop.f32.mrb[31].mxu1 }

</bundles_post_ra>
